<compile_context>
chip_gen: v5e
topology: v5e:2x2
jax: 0.10.0
libtpu: 0.0.40
codegen_flags: <defaults>
</compile_context>

<pallas_src>
import functools

import jax
import jax.numpy as jnp
from jax.experimental import pallas as pl
from jax.experimental.pallas import tpu as pltpu

H1 = 256
H2 = 128


def _round_up(n, m):
    return ((n + m - 1) // m) * m


def _cdiv(a, b):
    return -(-a // b)


def _mlp_kernel(x_ref, w1_ref, b1_ref, w2_ref, b2_ref, w3_ref, b3_ref, o_ref):
    # fc1: bf16 MXU matmul with f32 accumulation; bias + ReLU on the VPU in f32 (v5e-safe).
    x_bf = x_ref[...].astype(jnp.bfloat16)
    h1 = jnp.dot(x_bf, w1_ref[...], preferred_element_type=jnp.float32)
    h1 = jnp.maximum(h1 + b1_ref[...], 0.0)
    # fc2
    h2 = jnp.dot(h1.astype(jnp.bfloat16), w2_ref[...],
                 preferred_element_type=jnp.float32)
    h2 = jnp.maximum(h2 + b2_ref[...], 0.0)
    # fc3 (128 -> 1): VPU multiply + cross-lane reduce in f32 (127/128 MXU columns would be
    # zeros anyway), scalar bias from SMEM; output block is a compact (tb, 1) store.
    out = jnp.sum(h2 * w3_ref[...], axis=-1, keepdims=True) + b3_ref[0, 0]
    o_ref[...] = out.astype(o_ref.dtype)


def prepare_params(w1, b1, w2, b2, w3, b3):
    """One-time conversion to kernel-ready layout (hoisted out of the per-call forward path)."""
    D = w1.shape[0]
    assert w1.shape == (D, H1) and w2.shape == (H1, H2) and w3.shape == (H2, 1)
    return (
        w1.astype(jnp.bfloat16),                    # MXU operand
        b1.reshape(1, H1).astype(jnp.float32),
        w2.astype(jnp.bfloat16),                    # MXU operand
        b2.reshape(1, H2).astype(jnp.float32),
        w3.reshape(1, H2).astype(jnp.float32),      # fc3 weights as a lane row (VPU reduce)
        b3.reshape(1, 1).astype(jnp.float32),       # scalar fc3 bias -> SMEM
    )


def _pick_batch_tile(B, tile_b):
    if B <= 32:
        # single grid step; 16-row floor matches bf16 (16,128) packing for the MXU feed
        return max(16, _round_up(B, 16))
    # >= 2 grid steps keeps both v7x TensorCores busy; cap amortizes per-step overhead
    return max(16, min(tile_b, _round_up(_cdiv(B, 2), 16)))


@functools.partial(jax.jit, static_argnames=("tile_b",))
def regression_model_forward(x, params, *, tile_b=256):
    """Pallas forward for RegressionModel: relu(x@w1+b1) -> relu(@w2+b2) -> @w3+b3."""
    w1_bf, b1_2d, w2_bf, b2_2d, w3_row, b3_2d = params
    B, D = x.shape
    assert w1_bf.shape == (D, H1)

    tb = _pick_batch_tile(B, tile_b)
    grid = (_cdiv(B, tb),)   # non-divisible B handled by a masked boundary block

    in_specs = [
        pl.BlockSpec((tb, D), lambda i: (i, 0)),             # x tile (f32, cast in-kernel)
        pl.BlockSpec((D, H1), lambda i: (0, 0)),             # w1 (resident, bf16)
        pl.BlockSpec((1, H1), lambda i: (0, 0)),             # b1 (f32)
        pl.BlockSpec((H1, H2), lambda i: (0, 0)),            # w2 (bf16)
        pl.BlockSpec((1, H2), lambda i: (0, 0)),             # b2 (f32)
        pl.BlockSpec((1, H2), lambda i: (0, 0)),             # w3 row (f32)
        pl.BlockSpec(memory_space=pltpu.MemorySpace.SMEM),   # b3 scalar
    ]
    out_spec = pl.BlockSpec((tb, 1), lambda i: (i, 0))

    return pl.pallas_call(
        _mlp_kernel,
        out_shape=jax.ShapeDtypeStruct((B, 1), jnp.float32),
        grid=grid,
        in_specs=in_specs,
        out_specs=out_spec,
        compiler_params=pltpu.CompilerParams(
            dimension_semantics=("parallel",),
        ),
    )(x.astype(jnp.float32), w1_bf, b1_2d, w2_bf, b2_2d, w3_row, b3_2d)


def init_params(key, input_dim):
    """Deterministic PyTorch-like init: U(-1/sqrt(fan_in), 1/sqrt(fan_in))."""
    ks = jax.random.split(key, 6)

    def lin(kw, kb, fan_in, fan_out):
        bound = 1.0 / jnp.sqrt(fan_in)
        w = jax.random.uniform(kw, (fan_in, fan_out), jnp.float32, -bound, bound)
        b = jax.random.uniform(kb, (fan_out,), jnp.float32, -bound, bound)
        return w, b

    w1, b1 = lin(ks[0], ks[1], input_dim, H1)
    w2, b2 = lin(ks[2], ks[3], H1, H2)
    w3, b3 = lin(ks[4], ks[5], H2, 1)
    return w1, b1, w2, b2, w3, b3


if __name__ == "__main__":
    key = jax.random.PRNGKey(0)
    k_x, k_p = jax.random.split(key)

    input_dim = 512   # TF-IDF feature dimension (synthetic, small)
    batch = 16

    x = jax.random.normal(k_x, (batch, input_dim), dtype=jnp.float32)
    raw = init_params(k_p, input_dim)
    params = prepare_params(*raw)   # one-time: bf16 weights, bias rows, SMEM scalar

    out = regression_model_forward(x, params)
    out = jax.block_until_ready(out)

    # Reference in plain JAX with the same bf16-rounded MXU operands / f32 accumulation;
    # fc3 is done in f32 in both paths.
    w1, b1, w2, b2, w3, b3 = raw
    rt = lambda a: a.astype(jnp.bfloat16).astype(jnp.float32)  # bf16 round-trip
    hp = jax.lax.Precision.HIGHEST
    h1 = jnp.maximum(jnp.dot(rt(x), rt(w1), precision=hp) + b1.reshape(1, H1), 0.0)
    h2 = jnp.maximum(jnp.dot(rt(h1), rt(w2), precision=hp) + b2.reshape(1, H2), 0.0)
    ref = jnp.dot(h2, w3, precision=hp) + b3.reshape(1, 1)

    assert out.shape == (batch, 1)
    max_err = jnp.max(jnp.abs(out - ref))
    assert jnp.allclose(out, ref, atol=2e-2, rtol=2e-2), f"max abs err {max_err}"

    print("KERNEL_OK")
</pallas_src>

<mosaic_0001>
module attributes {stable_mosaic.version = 11 : i64} {
  func.func @_mlp_kernel(%arg0: i32, %arg1: memref<16x512xf32, #tpu.memory_space<vmem>>, %arg2: memref<512x256xbf16, #tpu.memory_space<vmem>>, %arg3: memref<1x256xf32, #tpu.memory_space<vmem>>, %arg4: memref<256x128xbf16, #tpu.memory_space<vmem>>, %arg5: memref<1x128xf32, #tpu.memory_space<vmem>>, %arg6: memref<1x128xf32, #tpu.memory_space<vmem>>, %arg7: memref<1x1xf32, #tpu.memory_space<smem>>, %arg8: memref<16x1xf32, #tpu.memory_space<vmem>>) attributes {dimension_semantics = [#tpu.dimension_semantics<parallel>], iteration_bounds = array<i64: 1>, scalar_prefetch = 0 : i64, scratch_operands = 0 : i64, tpu.core_type = #tpu.core_type<tc>, window_params = [{transform_indices = @transform_0, window_bounds = array<i64: 16, 512>}, {pipeline_mode = #tpu.pipeline_mode<synchronous>, transform_indices = @transform_1, window_bounds = array<i64: 512, 256>}, {pipeline_mode = #tpu.pipeline_mode<synchronous>, transform_indices = @transform_2, window_bounds = array<i64: 1, 256>}, {pipeline_mode = #tpu.pipeline_mode<synchronous>, transform_indices = @transform_3, window_bounds = array<i64: 256, 128>}, {pipeline_mode = #tpu.pipeline_mode<synchronous>, transform_indices = @transform_4, window_bounds = array<i64: 1, 128>}, {pipeline_mode = #tpu.pipeline_mode<synchronous>, transform_indices = @transform_5, window_bounds = array<i64: 1, 128>}, {transform_indices = @transform_6, window_bounds = array<i64: 1, 1>}, {transform_indices = @transform_7, window_bounds = array<i64: 16, 1>}]} {
    %c0 = arith.constant 0 : index
    %c0_0 = arith.constant 0 : index
    %0 = vector.load %arg1[%c0, %c0_0] : memref<16x512xf32, #tpu.memory_space<vmem>>, vector<16x512xf32>
    %1 = arith.truncf %0 : vector<16x512xf32> to vector<16x512xbf16>
    %c0_1 = arith.constant 0 : index
    %c0_2 = arith.constant 0 : index
    %2 = vector.load %arg2[%c0_1, %c0_2] : memref<512x256xbf16, #tpu.memory_space<vmem>>, vector<512x256xbf16>
    %cst = arith.constant dense<0.000000e+00> : vector<16x256xf32>
    %3 = tpu.matmul %1, %2, %cst {dimension_numbers = #tpu.dot_dimension_numbers<[1], [0], [0], [1], [0, 0, 1, 1], [], []>} : vector<16x512xbf16>, vector<512x256xbf16>, vector<16x256xf32> -> vector<16x256xf32>
    %c0_3 = arith.constant 0 : index
    %c0_4 = arith.constant 0 : index
    %4 = vector.load %arg3[%c0_3, %c0_4] : memref<1x256xf32, #tpu.memory_space<vmem>>, vector<1x256xf32>
    %5 = vector.broadcast %4 : vector<1x256xf32> to vector<16x256xf32>
    %6 = arith.addf %3, %5 : vector<16x256xf32>
    %cst_5 = arith.constant 0.000000e+00 : f32
    %7 = vector.broadcast %cst_5 : f32 to vector<16x256xf32>
    %8 = arith.maximumf %6, %7 : vector<16x256xf32>
    %9 = arith.truncf %8 : vector<16x256xf32> to vector<16x256xbf16>
    %c0_6 = arith.constant 0 : index
    %c0_7 = arith.constant 0 : index
    %10 = vector.load %arg4[%c0_6, %c0_7] : memref<256x128xbf16, #tpu.memory_space<vmem>>, vector<256x128xbf16>
    %cst_8 = arith.constant dense<0.000000e+00> : vector<16x128xf32>
    %11 = tpu.matmul %9, %10, %cst_8 {dimension_numbers = #tpu.dot_dimension_numbers<[1], [0], [0], [1], [0, 0, 1, 1], [], []>} : vector<16x256xbf16>, vector<256x128xbf16>, vector<16x128xf32> -> vector<16x128xf32>
    %c0_9 = arith.constant 0 : index
    %c0_10 = arith.constant 0 : index
    %12 = vector.load %arg5[%c0_9, %c0_10] : memref<1x128xf32, #tpu.memory_space<vmem>>, vector<1x128xf32>
    %13 = vector.broadcast %12 : vector<1x128xf32> to vector<16x128xf32>
    %14 = arith.addf %11, %13 : vector<16x128xf32>
    %cst_11 = arith.constant 0.000000e+00 : f32
    %15 = vector.broadcast %cst_11 : f32 to vector<16x128xf32>
    %16 = arith.maximumf %14, %15 : vector<16x128xf32>
    %c0_12 = arith.constant 0 : index
    %c0_13 = arith.constant 0 : index
    %17 = vector.load %arg6[%c0_12, %c0_13] : memref<1x128xf32, #tpu.memory_space<vmem>>, vector<1x128xf32>
    %18 = vector.broadcast %17 : vector<1x128xf32> to vector<16x128xf32>
    %19 = arith.mulf %16, %18 : vector<16x128xf32>
    %cst_14 = arith.constant dense<0.000000e+00> : vector<16xf32>
    %20 = vector.multi_reduction <add>, %19, %cst_14 [1] : vector<16x128xf32> to vector<16xf32>
    %21 = vector.shape_cast %20 : vector<16xf32> to vector<16x1xf32>
    %c0_15 = arith.constant 0 : index
    %c0_16 = arith.constant 0 : index
    %22 = memref.load %arg7[%c0_15, %c0_16] : memref<1x1xf32, #tpu.memory_space<smem>>
    %23 = vector.broadcast %22 : f32 to vector<16x1xf32>
    %24 = arith.addf %21, %23 : vector<16x1xf32>
    %c0_17 = arith.constant 0 : index
    %c0_18 = arith.constant 0 : index
    %25 = vector.load %arg8[%c0_17, %c0_18] : memref<16x1xf32, #tpu.memory_space<vmem>>, vector<16x1xf32>
    tpu.vector_store %arg8[%c0_17, %c0_18], %24 {strides = array<i32>} : memref<16x1xf32, #tpu.memory_space<vmem>>, vector<16x1xf32>,
    return
  }
  func.func @transform_0(%arg0: i32) -> (i32, i32) {
    %c0_i32 = arith.constant 0 : i32
    %c0_i32_0 = arith.constant 0 : i32
    return %arg0, %c0_i32 : i32, i32
  }
  func.func @transform_1(%arg0: i32) -> (i32, i32) {
    %c0_i32 = arith.constant 0 : i32
    %c0_i32_0 = arith.constant 0 : i32
    %c0_i32_1 = arith.constant 0 : i32
    return %c0_i32, %c0_i32_0 : i32, i32
  }
  func.func @transform_2(%arg0: i32) -> (i32, i32) {
    %c0_i32 = arith.constant 0 : i32
    %c0_i32_0 = arith.constant 0 : i32
    %c0_i32_1 = arith.constant 0 : i32
    return %c0_i32, %c0_i32_0 : i32, i32
  }
  func.func @transform_3(%arg0: i32) -> (i32, i32) {
    %c0_i32 = arith.constant 0 : i32
    %c0_i32_0 = arith.constant 0 : i32
    %c0_i32_1 = arith.constant 0 : i32
    return %c0_i32, %c0_i32_0 : i32, i32
  }
  func.func @transform_4(%arg0: i32) -> (i32, i32) {
    %c0_i32 = arith.constant 0 : i32
    %c0_i32_0 = arith.constant 0 : i32
    %c0_i32_1 = arith.constant 0 : i32
    return %c0_i32, %c0_i32_0 : i32, i32
  }
  func.func @transform_5(%arg0: i32) -> (i32, i32) {
    %c0_i32 = arith.constant 0 : i32
    %c0_i32_0 = arith.constant 0 : i32
    %c0_i32_1 = arith.constant 0 : i32
    return %c0_i32, %c0_i32_0 : i32, i32
  }
  func.func @transform_6(%arg0: i32) -> (i32, i32) {
    %c0_i32 = arith.constant 0 : i32
    %c0_i32_0 = arith.constant 0 : i32
    %c0_i32_1 = arith.constant 0 : i32
    return %c0_i32, %c0_i32_0 : i32, i32
  }
  func.func @transform_7(%arg0: i32) -> (i32, i32) {
    %c0_i32 = arith.constant 0 : i32
    %c0_i32_0 = arith.constant 0 : i32
    return %arg0, %c0_i32 : i32, i32
  }
}

</mosaic_0001>

<bundles_post_ra>
// kernel: regression_model_forward.1
= control target key start
LH: loop header
LB: loop body
LE: loop exit
PB: predicated region body
PF: predicated region fallthrough
CT: control target
= control target key end

     0   :  { %13 = vsyncpa [#allocation4], 0  ;;  %s1358_s0 = inlined_call_operand.hbm [shape: f32[16,512], index: 0, kind: input, shape index: {}]   ;;  %s1359_s1 = inlined_call_operand.hbm [shape: bf16[512,256], index: 1, kind: input, shape index: {}]   ;;  %s1360_s2 = inlined_call_operand.vmem [shape: f32[1,256], index: 2, kind: input, shape index: {}]   ;;  %s1361_s3 = inlined_call_operand.hbm [shape: bf16[256,128], index: 3, kind: input, shape index: {}]   ;;  %s1362_s4 = inlined_call_operand.vmem [shape: f32[1,128], index: 4, kind: input, shape index: {}]   ;;  %s1363_s5 = inlined_call_operand.vmem [shape: f32[1,128], index: 5, kind: input, shape index: {}]   ;;  %s1364_s6 = inlined_call_operand.<no memory space> [shape: f32[1,1], index: 6, kind: input, shape index: {}]   ;;  %s1365_s7 = inlined_call_operand.vmem [shape: f32[16,1], index: 7, kind: output, shape index: {}]  }
   0x1   :  { %14 = vsyncpa [#allocation6], 0  ;;  %s32_s26 = sshll.u32 %s1359_s1, 4  ;;  %s1266_s27 = smov [#allocation5]   ;;  %s33_s26 = int_to_ptr.hbm [resolvable:$true] %s32_s26 }
   0x2   :  { %s34_s28 = sshll.u32 %s1266_s27, 4  ;;  %s19_s8 = sshll.u32 %s1358_s0, 4  ;;  %s35_s28 = int_to_ptr.vmem [resolvable:$true] %s34_s28  ;;  %s20_s8 = int_to_ptr.hbm [resolvable:$true] %s19_s8 }
   0x3   :  { %s1267_s9 = smov 128   ;;  %s1268_s10 = smov 8  }
   0x4   :  { %40 = dma.hbm_to_vmem [thread:$0]  %s33_s26, 8192, %s35_s28, [#allocation6], %s1267_s9, %s1267_s9, %s1268_s10  }
   0x5   :  { %s1269_s11 = smov [#allocation3]   ;;  %s1270_s13 = smov 512  }
   0x6   :  { %s21_s12 = sshll.u32 %s1269_s11, 4  ;;  %s1271_s14 = smov 32   ;;  %s22_s12 = int_to_ptr.vmem [resolvable:$true] %s21_s12 }
   0x7   :  { %27 = dma.hbm_to_vmem [thread:$0]  %s20_s8, 1024, %s22_s12, [#allocation4], %s1270_s13, %s1270_s13, %s1271_s14  }
   0x8   :  { %s47_s16 = sshll.u32 %s1361_s3, 4  ;;  %s1272_s17 = smov [#allocation7]   ;;  %s48_s16 = int_to_ptr.hbm [resolvable:$true] %s47_s16 }
   0x9   :  { %s49_s18 = sshll.u32 %s1272_s17, 4  ;;  %s1273_s19 = smov 64   ;;  %s50_s18 = int_to_ptr.vmem [resolvable:$true] %s49_s18 }
   0xa   :  { %s1274_s0 = smov 4  }
   0xb   :  { %55 = dma.hbm_to_vmem [thread:$0]  %s48_s16, 2048, %s50_s18, [#allocation6], %s1273_s19, %s1273_s19, %s1274_s0  }
   0xc   :  { %1262 = dma.done.wait [#allocation4], 1024  }
   0xd   :  { %1263 = vsyncadd [#allocation4], 4294966272 }
   0xe   :  { %1264 = dma.done.wait [#allocation6], 10240  }
   0xf   :  { %1265 = vsyncadd [#allocation6], 4294957056  ;;  %v837_v0 = vld [vmem:[#allocation5 + $0x70] sm:$0xf]  ;;  %v1114_v1 = vld [vmem:[#allocation5 + $0x74] sm:$0xf0] }
  0x10   :  { %v901_v2 = vld [vmem:[#allocation5 + $0xf0] sm:$0xf]  ;;  %v838_v3 = vor.u32 %v1114_v1, %v837_v0  ;;  %v1130_v4 = vld [vmem:[#allocation5 + $0xf4] sm:$0xf0]  ;;  %v829_v11 = vld [vmem:[#allocation5 + $0x60] sm:$0xf] }
  0x11   :  { %v965_v5 = vld [vmem:[#allocation5 + $0x170] sm:$0xf]  ;;  %v1146_v6 = vld [vmem:[#allocation5 + $0x174] sm:$0xf0]  ;;  %v902_v7 = vor.u32 %v1130_v4, %v901_v2  ;;  %v1112_v13 = vld [vmem:[#allocation5 + $0x64] sm:$0xf0] }
  0x12   :  { %v966_v8 = vor.u32 %v1146_v6, %v965_v5  ;;  %v1029_v9 = vld [vmem:[#allocation5 + $0x1f0] sm:$0xf]  ;;  %v1162_v10 = vld [vmem:[#allocation5 + $0x1f4] sm:$0xf0]  ;;  %476 = vmatpush.bf16.msra.mxu0 %v838_v3  ;;  %v893_v14 = vld [vmem:[#allocation5 + $0xe0] sm:$0xf]  ;;  %v830_v16 = vor.u32 %v1112_v13, %v829_v11 }
  0x13   :  { %v1030_v12 = vor.u32 %v1162_v10, %v1029_v9  ;;  %v1128_v15 = vld [vmem:[#allocation5 + $0xe4] sm:$0xf0]  ;;  %490 = vmatpush.bf16.msra.mxu1 %v902_v7  ;;  %v957_v18 = vld [vmem:[#allocation5 + $0x160] sm:$0xf]  ;;  %v821_v23 = vld [vmem:[#allocation5 + $0x50] sm:$0xf] }
  0x14   :  { %504 = vmatpush.bf16.msra.mxu2 %v966_v8  ;;  %v894_v17 = vor.u32 %v1128_v15, %v893_v14  ;;  %v1144_v19 = vld [vmem:[#allocation5 + $0x164] sm:$0xf0]  ;;  %v1021_v20 = vld [vmem:[#allocation5 + $0x1e0] sm:$0xf]  ;;  %v1110_v24 = vld [vmem:[#allocation5 + $0x54] sm:$0xf0] }
  0x15   :  { %518 = vmatpush.bf16.msra.mxu3 %v1030_v12  ;;  %v958_v21 = vor.u32 %v1144_v19, %v957_v18  ;;  %v1160_v22 = vld [vmem:[#allocation5 + $0x1e4] sm:$0xf0]  ;;  %v885_v26 = vld [vmem:[#allocation5 + $0xd0] sm:$0xf]  ;;  %v1126_v27 = vld [vmem:[#allocation5 + $0xd4] sm:$0xf0]  ;;  %v822_v29 = vor.u32 %v1110_v24, %v821_v23 }
  0x16   :  { %v1022_v25 = vor.u32 %v1160_v22, %v1021_v20  ;;  %v949_v28 = vld [vmem:[#allocation5 + $0x150] sm:$0xf]  ;;  %477 = vmatpush.bf16.msra.mxu0 %v830_v16  ;;  %v1142_v30 = vld [vmem:[#allocation5 + $0x154] sm:$0xf0]  ;;  %v886_v33 = vor.u32 %v1126_v27, %v885_v26  ;;  %v813_v35 = vld [vmem:[#allocation5 + $0x40] sm:$0xf] }
  0x17   :  { %v1013_v31 = vld [vmem:[#allocation5 + $0x1d0] sm:$0xf]  ;;  %v1158_v32 = vld [vmem:[#allocation5 + $0x1d4] sm:$0xf0]  ;;  %491 = vmatpush.bf16.msra.mxu1 %v894_v17  ;;  %v950_v34 = vor.u32 %v1142_v30, %v949_v28  ;;  %v1108_v36 = vld [vmem:[#allocation5 + $0x44] sm:$0xf0] }
  0x18   :  { %505 = vmatpush.bf16.msra.mxu2 %v958_v21  ;;  %v877_v37 = vld [vmem:[#allocation5 + $0xc0] sm:$0xf]  ;;  %v1014_v38 = vor.u32 %v1158_v32, %v1013_v31  ;;  %v1124_v39 = vld [vmem:[#allocation5 + $0xc4] sm:$0xf0]  ;;  %v814_v44 = vor.u32 %v1108_v36, %v813_v35  ;;  %v805_v47 = vld [vmem:[#allocation5 + $0x30] sm:$0xf] }
  0x19   :  { %519 = vmatpush.bf16.msra.mxu3 %v1022_v25  ;;  %v941_v40 = vld [vmem:[#allocation5 + $0x140] sm:$0xf]  ;;  %v1140_v41 = vld [vmem:[#allocation5 + $0x144] sm:$0xf0]  ;;  %v878_v45 = vor.u32 %v1124_v39, %v877_v37  ;;  %v1106_v48 = vld [vmem:[#allocation5 + $0x34] sm:$0xf0] }
  0x1a   :  { %v1005_v42 = vld [vmem:[#allocation5 + $0x1c0] sm:$0xf]  ;;  %v1156_v43 = vld [vmem:[#allocation5 + $0x1c4] sm:$0xf0]  ;;  %478 = vmatpush.bf16.msra.mxu0 %v822_v29  ;;  %v942_v46 = vor.u32 %v1140_v41, %v941_v40  ;;  %v869_v49 = vld [vmem:[#allocation5 + $0xb0] sm:$0xf]  ;;  %v806_v56 = vor.u32 %v1106_v48, %v805_v47 }
  0x1b   :  { %492 = vmatpush.bf16.msra.mxu1 %v886_v33  ;;  %v1006_v50 = vor.u32 %v1156_v43, %v1005_v42  ;;  %v1122_v51 = vld [vmem:[#allocation5 + $0xb4] sm:$0xf0]  ;;  %v933_v52 = vld [vmem:[#allocation5 + $0x130] sm:$0xf]  ;;  %v797_v59 = vld [vmem:[#allocation5 + $0x20] sm:$0xf] }
  0x1c   :  { %506 = vmatpush.bf16.msra.mxu2 %v950_v34  ;;  %v1138_v53 = vld [vmem:[#allocation5 + $0x134] sm:$0xf0]  ;;  %v997_v54 = vld [vmem:[#allocation5 + $0x1b0] sm:$0xf]  ;;  %v870_v57 = vor.u32 %v1122_v51, %v869_v49  ;;  %v1104_v60 = vld [vmem:[#allocation5 + $0x24] sm:$0xf0] }
  0x1d   :  { %520 = vmatpush.bf16.msra.mxu3 %v1014_v38  ;;  %v1154_v55 = vld [vmem:[#allocation5 + $0x1b4] sm:$0xf0]  ;;  %v934_v58 = vor.u32 %v1138_v53, %v933_v52  ;;  %v861_v61 = vld [vmem:[#allocation5 + $0xa0] sm:$0xf]  ;;  %v1120_v63 = vld [vmem:[#allocation5 + $0xa4] sm:$0xf0]  ;;  %v798_v4 = vor.u32 %v1104_v60, %v797_v59 }
  0x1e   :  { %479 = vmatpush.bf16.msra.mxu0 %v814_v44  ;;  %v998_v62 = vor.u32 %v1154_v55, %v997_v54  ;;  %v925_v0 = vld [vmem:[#allocation5 + $0x120] sm:$0xf]  ;;  %v1136_v1 = vld [vmem:[#allocation5 + $0x124] sm:$0xf0]  ;;  %v789_v5 = vld [vmem:[#allocation5 + $0x10] sm:$0xf]  ;;  %v862_v6 = vor.u32 %v1120_v63, %v861_v61 }
  0x1f   :  { %493 = vmatpush.bf16.msra.mxu1 %v878_v45  ;;  %v989_v2 = vld [vmem:[#allocation5 + $0x1a0] sm:$0xf]  ;;  %v1152_v3 = vld [vmem:[#allocation5 + $0x1a4] sm:$0xf0]  ;;  %v926_v7 = vor.u32 %v1136_v1, %v925_v0  ;;  %v1102_v8 = vld [vmem:[#allocation5 + $0x14] sm:$0xf0] }
  0x20   :  { %507 = vmatpush.bf16.msra.mxu2 %v942_v46  ;;  %v853_v9 = vld [vmem:[#allocation5 + $0x90] sm:$0xf]  ;;  %v1118_v10 = vld [vmem:[#allocation5 + $0x94] sm:$0xf0]  ;;  %v990_v11 = vor.u32 %v1152_v3, %v989_v2  ;;  %v781_v16 = vld [vmem:[#allocation5] sm:$0xf]  ;;  %v790_v18 = vor.u32 %v1102_v8, %v789_v5 }
  0x21   :  { %521 = vmatpush.bf16.msra.mxu3 %v1006_v50  ;;  %v917_v12 = vld [vmem:[#allocation5 + $0x110] sm:$0xf]  ;;  %v1134_v13 = vld [vmem:[#allocation5 + $0x114] sm:$0xf0]  ;;  %v1100_v17 = vld [vmem:[#allocation5 + $0x4] sm:$0xf0]  ;;  %v854_v23 = vor.u32 %v1118_v10, %v853_v9 }
  0x22   :  { %480 = vmatpush.bf16.msra.mxu0 %v806_v56  ;;  %v981_v14 = vld [vmem:[#allocation5 + $0x190] sm:$0xf]  ;;  %v1150_v15 = vld [vmem:[#allocation5 + $0x194] sm:$0xf0]  ;;  %v845_v19 = vld [vmem:[#allocation5 + $0x80] sm:$0xf]  ;;  %v918_v24 = vor.u32 %v1134_v13, %v917_v12  ;;  %v782_v35 = vor.u32 %v1100_v17, %v781_v16 }
  0x23   :  { %494 = vmatpush.bf16.msra.mxu1 %v870_v57  ;;  %v1116_v20 = vld [vmem:[#allocation5 + $0x84] sm:$0xf0]  ;;  %v909_v21 = vld [vmem:[#allocation5 + $0x100] sm:$0xf]  ;;  %v1113_v27 = vld [vmem:[#allocation5 + $0x74] sm:$0xf]  ;;  %v982_v28 = vor.u32 %v1150_v15, %v981_v14 }
  0x24   :  { %508 = vmatpush.bf16.msra.mxu2 %v934_v58  ;;  %v1132_v22 = vld [vmem:[#allocation5 + $0x104] sm:$0xf0]  ;;  %v973_v25 = vld [vmem:[#allocation5 + $0x180] sm:$0xf]  ;;  %v839_v29 = vld [vmem:[#allocation5 + $0x78] sm:$0xf0]  ;;  %v846_v39 = vor.u32 %v1116_v20, %v845_v19 }
  0x25   :  { %522 = vmatpush.bf16.msra.mxu3 %v998_v62  ;;  %v1148_v26 = vld [vmem:[#allocation5 + $0x184] sm:$0xf0]  ;;  %v1129_v30 = vld [vmem:[#allocation5 + $0xf4] sm:$0xf]  ;;  %v903_v31 = vld [vmem:[#allocation5 + $0xf8] sm:$0xf0]  ;;  %v910_v40 = vor.u32 %v1132_v22, %v909_v21  ;;  %v842_v45 = vor.u32 %v1113_v27, %v839_v29 }
  0x26   :  { %481 = vmatpush.bf16.msra.mxu0 %v798_v4  ;;  %v1145_v32 = vld [vmem:[#allocation5 + $0x174] sm:$0xf]  ;;  %v967_v33 = vld [vmem:[#allocation5 + $0x178] sm:$0xf0]  ;;  %v74_v41 = vld [vmem:[#allocation3] sm:$0xff]  ;;  %v974_v44 = vor.u32 %v1148_v26, %v973_v25  ;;  %v906_v49 = vor.u32 %v1129_v30, %v903_v31  ;;  %vm770_vm0 = vcmask 7168  }
  0x27   :  { %495 = vmatpush.bf16.msra.mxu1 %v862_v6  ;;  %v1161_v34 = vld [vmem:[#allocation5 + $0x1f4] sm:$0xf]  ;;  %v1031_v36 = vld [vmem:[#allocation5 + $0x1f8] sm:$0xf0]  ;;  %v78_v42 = vld [vmem:[#allocation3 + $0x20] sm:$0xff]  ;;  %v970_v50 = vor.u32 %v1145_v32, %v967_v33 }
  0x28   :  { %509 = vmatpush.bf16.msra.mxu2 %v926_v7  ;;  %v76_v37 = vld [vmem:[#allocation3 + $0x10] sm:$0xff]  ;;  %v77_v43 = vld [vmem:[#allocation3 + $0x18] sm:$0xff]  ;;  %v1111_v47 = vld [vmem:[#allocation5 + $0x64] sm:$0xf]  ;;  %v1034_v54 = vor.u32 %v1161_v34, %v1031_v36  ;;  %v1326_v59 = vpack.c.bf16 %v78_v42, %v74_v41 }
  0x29   :  { %523 = vmatpush.bf16.msra.mxu3 %v990_v11  ;;  %v80_v38 = vld [vmem:[#allocation3 + $0x30] sm:$0xff]  ;;  %v81_v46 = vld [vmem:[#allocation3 + $0x38] sm:$0xff]  ;;  %v831_v48 = vld [vmem:[#allocation5 + $0x68] sm:$0xf0] }
  0x2a   :  { %482 = vmatpush.bf16.msra.mxu0 %v790_v18  ;;  %v1127_v51 = vld [vmem:[#allocation5 + $0xe4] sm:$0xf]  ;;  %v75_v52 = vld [vmem:[#allocation3 + $0x8] sm:$0xff]  ;;  %v1324_v55 = vpack.c.bf16 %v80_v38, %v76_v37  ;;  %v1328_v60 = vpack.c.bf16 %v81_v46, %v77_v43  ;;  %v834_v63 = vor.u32 %v1111_v47, %v831_v48  ;;  %v1109_v3 = vld [vmem:[#allocation5 + $0x54] sm:$0xf] }
  0x2b   :  { %496 = vmatpush.bf16.msra.mxu1 %v854_v23  ;;  %v79_v53 = vld [vmem:[#allocation3 + $0x28] sm:$0xff]  ;;  %v1143_v57 = vld [vmem:[#allocation5 + $0x164] sm:$0xf]  ;;  %v823_v4 = vld [vmem:[#allocation5 + $0x58] sm:$0xf0] }
  0x2c   :  { %510 = vmatpush.bf16.msra.mxu2 %v918_v24  ;;  %v895_v56 = vld [vmem:[#allocation5 + $0xe8] sm:$0xf0]  ;;  %v1159_v61 = vld [vmem:[#allocation5 + $0x1e4] sm:$0xf]  ;;  %v1330_v0 = vpack.c.bf16 %v79_v53, %v75_v52  ;;  %v1125_v5 = vld [vmem:[#allocation5 + $0xd4] sm:$0xf]  ;;  %v826_v12 = vor.u32 %v1109_v3, %v823_v4 }
  0x2d   :  { %524 = vmatpush.bf16.msra.mxu3 %v982_v28  ;;  %v959_v58 = vld [vmem:[#allocation5 + $0x168] sm:$0xf0]  ;;  %v898_v1 = vor.u32 %v1127_v51, %v895_v56  ;;  %v887_v7 = vld [vmem:[#allocation5 + $0xd8] sm:$0xf0]  ;;  %v1141_v8 = vld [vmem:[#allocation5 + $0x154] sm:$0xf] }
  0x2e   :  { %483 = vmatpush.bf16.msra.mxu0 %v782_v35  ;;  %v1023_v62 = vld [vmem:[#allocation5 + $0x1e8] sm:$0xf0]  ;;  %v962_v2 = vor.u32 %v1143_v57, %v959_v58  ;;  %v951_v9 = vld [vmem:[#allocation5 + $0x158] sm:$0xf0]  ;;  %v1157_v10 = vld [vmem:[#allocation5 + $0x1d4] sm:$0xf]  ;;  %v890_v13 = vor.u32 %v1125_v5, %v887_v7 }
  0x2f   :  { %497 = vmatpush.bf16.msra.mxu1 %v846_v39  ;;  %v1026_v6 = vor.u32 %v1159_v61, %v1023_v62  ;;  %v1015_v11 = vld [vmem:[#allocation5 + $0x1d8] sm:$0xf0]  ;;  %v954_v14 = vor.u32 %v1141_v8, %v951_v9  ;;  %v1107_v15 = vld [vmem:[#allocation5 + $0x44] sm:$0xf]  ;;  %v815_v16 = vld [vmem:[#allocation5 + $0x48] sm:$0xf0] }
  0x30   :  { %511 = vmatpush.bf16.msra.mxu2 %v910_v40  ;;  %v1123_v17 = vld [vmem:[#allocation5 + $0xc4] sm:$0xf]  ;;  %v1018_v18 = vor.u32 %v1157_v10, %v1015_v11  ;;  %v879_v19 = vld [vmem:[#allocation5 + $0xc8] sm:$0xf0]  ;;  %v818_v24 = vor.u32 %v1107_v15, %v815_v16  ;;  %v1105_v27 = vld [vmem:[#allocation5 + $0x34] sm:$0xf] }
  0x31   :  { %525 = vmatpush.bf16.msra.mxu3 %v974_v44  ;;  %484 = vmatmul.bf16.vlgmr.msra.gmra.mxu0 %v1326_v59  ;;  %v1139_v20 = vld [vmem:[#allocation5 + $0x144] sm:$0xf]  ;;  %v943_v21 = vld [vmem:[#allocation5 + $0x148] sm:$0xf0]  ;;  %v882_v25 = vor.u32 %v1123_v17, %v879_v19  ;;  %v807_v28 = vld [vmem:[#allocation5 + $0x38] sm:$0xf0] }
  0x32   :  { %532 = vmatpush.bf16.msrb.mxu0 %v842_v45  ;;  %498 = vmatmul.bf16.vlgmr.msra.gmra.mxu1 %v1330_v0  ;;  %v1155_v22 = vld [vmem:[#allocation5 + $0x1c4] sm:$0xf]  ;;  %v1007_v23 = vld [vmem:[#allocation5 + $0x1c8] sm:$0xf0]  ;;  %v946_v26 = vor.u32 %v1139_v20, %v943_v21  ;;  %v1121_v29 = vld [vmem:[#allocation5 + $0xb4] sm:$0xf]  ;;  %v810_v36 = vor.u32 %v1105_v27, %v807_v28 }
  0x33   :  { %546 = vmatpush.bf16.msrb.mxu1 %v906_v49  ;;  %512 = vmatmul.bf16.vlgmr.msra.gmra.mxu2 %v1324_v55  ;;  %v1010_v30 = vor.u32 %v1155_v22, %v1007_v23  ;;  %v871_v31 = vld [vmem:[#allocation5 + $0xb8] sm:$0xf0]  ;;  %v1137_v32 = vld [vmem:[#allocation5 + $0x134] sm:$0xf]  ;;  %v1103_v37 = vld [vmem:[#allocation5 + $0x24] sm:$0xf] }
  0x34   :  { %560 = vmatpush.bf16.msrb.mxu2 %v970_v50  ;;  %526 = vmatmul.bf16.vlgmr.msra.gmra.mxu3 %v1328_v60  ;;  %v935_v33 = vld [vmem:[#allocation5 + $0x138] sm:$0xf0]  ;;  %v1153_v34 = vld [vmem:[#allocation5 + $0x1b4] sm:$0xf]  ;;  %v799_v38 = vld [vmem:[#allocation5 + $0x28] sm:$0xf0]  ;;  %v874_v39 = vor.u32 %v1121_v29, %v871_v31 }
  0x35   :  { %574 = vmatpush.bf16.msrb.mxu3 %v1034_v54  ;;  %v999_v35 = vld [vmem:[#allocation5 + $0x1b8] sm:$0xf0]  ;;  %v938_v40 = vor.u32 %v1137_v32, %v935_v33  ;;  %v1119_v41 = vld [vmem:[#allocation5 + $0xa4] sm:$0xf]  ;;  %v863_v42 = vld [vmem:[#allocation5 + $0xa8] sm:$0xf0]  ;;  %v802_v48 = vor.u32 %v1103_v37, %v799_v38 }
  0x36   :  { %533 = vmatpush.bf16.msrb.mxu0 %v834_v63  ;;  %v1002_v43 = vor.u32 %v1153_v34, %v999_v35  ;;  %v1135_v44 = vld [vmem:[#allocation5 + $0x124] sm:$0xf]  ;;  %v927_v45 = vld [vmem:[#allocation5 + $0x128] sm:$0xf0]  ;;  %v866_v49 = vor.u32 %v1119_v41, %v863_v42  ;;  %v1101_v51 = vld [vmem:[#allocation5 + $0x14] sm:$0xf] }
  0x37   :  { %547 = vmatpush.bf16.msrb.mxu1 %v898_v1  ;;  %v1151_v46 = vld [vmem:[#allocation5 + $0x1a4] sm:$0xf]  ;;  %v991_v47 = vld [vmem:[#allocation5 + $0x1a8] sm:$0xf0]  ;;  %v930_v50 = vor.u32 %v1135_v44, %v927_v45  ;;  %v791_v52 = vld [vmem:[#allocation5 + $0x18] sm:$0xf0] }
  0x38   :  { %561 = vmatpush.bf16.msrb.mxu2 %v962_v2  ;;  %v1117_v53 = vld [vmem:[#allocation5 + $0x94] sm:$0xf]  ;;  %v994_v54 = vor.u32 %v1151_v46, %v991_v47  ;;  %v855_v56 = vld [vmem:[#allocation5 + $0x98] sm:$0xf0]  ;;  %v794_v63 = vor.u32 %v1101_v51, %v791_v52  ;;  %v1099_v3 = vld [vmem:[#allocation5 + $0x4] sm:$0xf] }
  0x39   :  { %575 = vmatpush.bf16.msrb.mxu3 %v1026_v6  ;;  %v1133_v57 = vld [vmem:[#allocation5 + $0x114] sm:$0xf]  ;;  %v919_v58 = vld [vmem:[#allocation5 + $0x118] sm:$0xf0]  ;;  %v858_v1 = vor.u32 %v1117_v53, %v855_v56  ;;  %v783_v4 = vld [vmem:[#allocation5 + $0x8] sm:$0xf0] }
  0x3a   :  { %534 = vmatpush.bf16.msrb.mxu0 %v826_v12  ;;  %v1149_v61 = vld [vmem:[#allocation5 + $0x194] sm:$0xf]  ;;  %v983_v62 = vld [vmem:[#allocation5 + $0x198] sm:$0xf0]  ;;  %v922_v2 = vor.u32 %v1133_v57, %v919_v58  ;;  %v1115_v5 = vld [vmem:[#allocation5 + $0x84] sm:$0xf]  ;;  %v786_v12 = vor.u32 %v1099_v3, %v783_v4 }
  0x3b   :  { %548 = vmatpush.bf16.msrb.mxu1 %v890_v13  ;;  %v986_v6 = vor.u32 %v1149_v61, %v983_v62  ;;  %v847_v7 = vld [vmem:[#allocation5 + $0x88] sm:$0xf0]  ;;  %v1131_v8 = vld [vmem:[#allocation5 + $0x104] sm:$0xf]  ;;  %v1170_v16 = vld [vmem:[#allocation7 + $0x38] sm:$0xff] }
  0x3c   :  { %562 = vmatpush.bf16.msrb.mxu2 %v954_v14  ;;  %v911_v9 = vld [vmem:[#allocation5 + $0x108] sm:$0xf0]  ;;  %v1147_v10 = vld [vmem:[#allocation5 + $0x184] sm:$0xf]  ;;  %v850_v13 = vor.u32 %v1115_v5, %v847_v7  ;;  %v1169_v17 = vld [vmem:[#allocation7 + $0x30] sm:$0xff] }
  0x3d   :  { %576 = vmatpush.bf16.msrb.mxu3 %v1018_v18  ;;  %v975_v11 = vld [vmem:[#allocation5 + $0x188] sm:$0xf0]  ;;  %v914_v14 = vor.u32 %v1131_v8, %v911_v9  ;;  %v1167_v19 = vld [vmem:[#allocation7 + $0x20] sm:$0xff]  ;;  %v1166_v20 = vld [vmem:[#allocation7 + $0x18] sm:$0xff] }
  0x3e   :  { %535 = vmatpush.bf16.msrb.mxu0 %v818_v24  ;;  %v978_v15 = vor.u32 %v1147_v10, %v975_v11  ;;  %v1168_v18 = vld [vmem:[#allocation7 + $0x28] sm:$0xff]  ;;  %v1165_v21 = vld [vmem:[#allocation7 + $0x10] sm:$0xff]  ;;  %v1163_v23 = vld [vmem:[#allocation7] sm:$0xff] }
  0x3f   :  { %549 = vmatpush.bf16.msrb.mxu1 %v882_v25  ;;  %v1164_v22 = vld [vmem:[#allocation7 + $0x8] sm:$0xff]  ;;  %v1178_v24 = vld [vmem:[#allocation7 + $0x78] sm:$0xff]  ;;  %v1175_v25 = vld [vmem:[#allocation7 + $0x60] sm:$0xff] }
  0x40   :  { %563 = vmatpush.bf16.msrb.mxu2 %v946_v26  ;;  %v1173_v35 = vld [vmem:[#allocation7 + $0x50] sm:$0xff]  ;;  %v1171_v46 = vld [vmem:[#allocation7 + $0x40] sm:$0xff] }
  0x41   :  { %577 = vmatpush.bf16.msrb.mxu3 %v1010_v30  ;;  %v1174_v30 = vld [vmem:[#allocation7 + $0x58] sm:$0xff]  ;;  %v1188_v10 = vld [vmem:[%s1362_s4] ss:$0 sm:$0xff] }
  0x42   :  { %536 = vmatpush.bf16.msrb.mxu0 %v810_v36 }
  0x43   :  { %550 = vmatpush.bf16.msrb.mxu1 %v874_v39 }
  0x44   :  { %564 = vmatpush.bf16.msrb.mxu2 %v938_v40  ;;  %v1172_v40 = vld [vmem:[#allocation7 + $0x48] sm:$0xff] }
  0x45   :  { %578 = vmatpush.bf16.msrb.mxu3 %v1002_v43 }
  0x46   :  { %537 = vmatpush.bf16.msrb.mxu0 %v802_v48 }
  0x47   :  { %551 = vmatpush.bf16.msrb.mxu1 %v866_v49 }
  0x48   :  { %565 = vmatpush.bf16.msrb.mxu2 %v930_v50 }
  0x49   :  { %579 = vmatpush.bf16.msrb.mxu3 %v994_v54 }
  0x4a   :  { %538 = vmatpush.bf16.msrb.mxu0 %v794_v63 }
  0x4b   :  { %552 = vmatpush.bf16.msrb.mxu1 %v858_v1 }
  0x4c   :  { %566 = vmatpush.bf16.msrb.mxu2 %v922_v2 }
  0x4d   :  { %580 = vmatpush.bf16.msrb.mxu3 %v986_v6 }
  0x4e   :  { %539 = vmatpush.bf16.msrb.mxu0 %v786_v12 }
  0x4f   :  { %553 = vmatpush.bf16.msrb.mxu1 %v850_v13 }
  0x50   :  { %567 = vmatpush.bf16.msrb.mxu2 %v914_v14  ;;  %v1189_v14 = vld [vmem:[%s1363_s5] ss:$0 sm:$0xff] }
  0x51   :  { %581 = vmatpush.bf16.msrb.mxu3 %v978_v15  ;;  %540 = vmatmul.bf16.vlgmr.msrb.gmra.mxu0 %v1326_v59  ;;  %v1177_v59 = vld [vmem:[#allocation7 + $0x70] sm:$0xff] }
  0x52   :  { %726 = vmatpush.bf16.msra.mxu0 %v1170_v16  ;;  %554 = vmatmul.bf16.vlgmr.msrb.gmra.mxu1 %v1330_v0 }
  0x53   :  { %568 = vmatmul.bf16.vlgmr.msrb.gmra.mxu2 %v1324_v55  ;;  %740 = vmatpush.bf16.msra.mxu1 %v1178_v24  ;;  %v150_v55 = vld [vmem:[%s1360_s2] sm:$0x3] }
  0x54   :  { %582 = vmatmul.bf16.vlgmr.msrb.gmra.mxu3 %v1328_v60  ;;  %v1176_v60 = vld [vmem:[#allocation7 + $0x68] sm:$0xff]  ;;  %v152_v0 = vperm.slane %v150_v55, 0  ;;  %v153_v49 = vperm.slane %v150_v55, 1 }
  0x56   :  { %727 = vmatpush.bf16.msra.mxu0 %v1169_v17 }
  0x57   :  { %741 = vmatpush.bf16.msra.mxu1 %v1177_v59 }
  0x5a   :  { %728 = vmatpush.bf16.msra.mxu0 %v1168_v18 }
  0x5b   :  { %742 = vmatpush.bf16.msra.mxu1 %v1176_v60 }
  0x5e   :  { %729 = vmatpush.bf16.msra.mxu0 %v1167_v19 }
  0x5f   :  { %743 = vmatpush.bf16.msra.mxu1 %v1175_v25 }
  0x62   :  { %730 = vmatpush.bf16.msra.mxu0 %v1166_v20 }
  0x63   :  { %744 = vmatpush.bf16.msra.mxu1 %v1174_v30 }
  0x66   :  { %731 = vmatpush.bf16.msra.mxu0 %v1165_v21 }
  0x67   :  { %745 = vmatpush.bf16.msra.mxu1 %v1173_v35 }
  0x6a   :  { %732 = vmatpush.bf16.msra.mxu0 %v1164_v22 }
  0x6b   :  { %746 = vmatpush.bf16.msra.mxu1 %v1172_v40 }
  0x6e   :  { %733 = vmatpush.bf16.msra.mxu0 %v1163_v23  ;;  %v767_v23 = vstv %s1364_s6 }
  0x6f   :  { %747 = vmatpush.bf16.msra.mxu1 %v1171_v46 }
  0xae   :  { %v485_v26 = vpop.f32.mrf.mxu0 }
  0xaf   :  { %v486_v27 = vadd.f32 %v485_v26, %v152_v0  ;;  %v499_v28 = vpop.f32.mrf.mxu1 }
  0xb1   :  { %v500_v29 = vadd.f32 %v499_v28, %v486_v27 }
  0xb6   :  { %v513_v31 = vpop.f32.mrf.mxu2  ;;  %v487_v34 = vpop.f32.mrf.mxu0 }
  0xb7   :  { %v527_v32 = vpop.f32.mrf.mxu3  ;;  %v514_v33 = vadd.f32 %v513_v31, %v500_v29  ;;  %v488_v36 = vadd.f32 %v487_v34, %v152_v0  ;;  %v501_v37 = vpop.f32.mrf.mxu1 }
  0xb9   :  { %v502_v38 = vadd.f32 %v501_v37, %v488_v36  ;;  %v528_v39 = vadd.f32 %v527_v32, %v514_v33 }
  0xbb   :  { %v588_v44 = vmax.f32 %v528_v39, 0.0 }
  0xbe   :  { %v515_v41 = vpop.f32.mrf.mxu2 }
  0xbf   :  { %v516_v42 = vadd.f32 %v515_v41, %v502_v38  ;;  %v529_v43 = vpop.f32.mrf.mxu3 }
  0xc1   :  { %v530_v45 = vadd.f32 %v529_v43, %v516_v42 }
  0xc3   :  { %v590_v47 = vmax.f32 %v530_v45, 0.0 }
  0xc5   :  { %v592_v48 = vpack.c.bf16 %v590_v47, %v588_v44 }
  0xc7   :  { %734 = vmatmul.bf16.vlgmr.msra.gmra.mxu0 %v592_v48 }
  0xce   :  { %v541_v50 = vpop.f32.mrf.mxu0 }
  0xcf   :  { %v555_v51 = vpop.f32.mrf.mxu1  ;;  %v542_v52 = vadd.f32 %v541_v50, %v153_v49 }
  0xd1   :  { %v556_v54 = vadd.f32 %v555_v51, %v542_v52 }
  0xd6   :  { %v569_v53 = vpop.f32.mrf.mxu2  ;;  %v543_v57 = vpop.f32.mrf.mxu0 }
  0xd7   :  { %v583_v56 = vpop.f32.mrf.mxu3  ;;  %v544_v58 = vadd.f32 %v543_v57, %v153_v49  ;;  %v570_v61 = vadd.f32 %v569_v53, %v556_v54  ;;  %v557_v62 = vpop.f32.mrf.mxu1 }
  0xd9   :  { %v558_v63 = vadd.f32 %v557_v62, %v544_v58  ;;  %v584_v2 = vadd.f32 %v583_v56, %v570_v61 }
  0xdb   :  { %v589_v6 = vmax.f32 %v584_v2, 0.0 }
  0xde   :  { %v571_v1 = vpop.f32.mrf.mxu2 }
  0xdf   :  { %v572_v3 = vadd.f32 %v571_v1, %v558_v63  ;;  %v585_v4 = vpop.f32.mrf.mxu3 }
  0xe1   :  { %v586_v5 = vadd.f32 %v585_v4, %v572_v3 }
  0xe3   :  { %v591_v7 = vmax.f32 %v586_v5, 0.0 }
  0xe5   :  { %v593_v8 = vpack.c.bf16 %v591_v7, %v589_v6 }
  0xe7   :  { %748 = vmatmul.bf16.vlgmr.msra.gmra.mxu1 %v593_v8 }
 0x144   :  { %v735_v9 = vpop.f32.mrf.mxu0 }
 0x145   :  { %v736_v11 = vadd.f32 %v1188_v10, %v735_v9 }
 0x14c   :  { %v737_v16 = vpop.f32.mrf.mxu0 }
 0x14d   :  { %v738_v18 = vadd.f32 %v1188_v10, %v737_v16 }
 0x164   :  { %v749_v12 = vpop.f32.mrf.mxu1 }
 0x165   :  { %v750_v13 = vadd.f32 %v749_v12, %v736_v11 }
 0x167   :  { %v754_v15 = vmax.f32 %v750_v13, 0.0 }
 0x169   :  { %v760_v17 = vmul.f32 %v1189_v14, %v754_v15 }
 0x16b   :  { %762 = vadd.xlane.f32.xlu0 %v760_v17 }
 0x16c   :  { %v751_v19 = vpop.f32.mrf.mxu1 }
 0x16d   :  { %v752_v20 = vadd.f32 %v751_v19, %v738_v18 }
 0x16f   :  { %v755_v21 = vmax.f32 %v752_v20, 0.0 }
 0x171   :  { %v761_v22 = vmul.f32 %v1189_v14, %v755_v21 }
 0x173   :  { %764 = vadd.xlane.f32.xlu0 %v761_v22 }
 0x1de   :  { %v763_v24 = vpop.xlane.xlu0 %762 }
 0x1df   :  { %v768_v59 = vadd.f32 %v767_v23, %v763_v24 }
 0x1e1   :  { %771 = vst.msk [vmem:[%s1365_s7] sm:$0xff] %vm770_vm0, %v768_v59 }
 0x1e6   :  { %v765_v55 = vpop.xlane.xlu0 %764 }
 0x1e7   :  { %v769_v60 = vadd.f32 %v767_v23, %v765_v55 }
 0x1e9   :  { %772 = vst.msk [vmem:[%s1365_s7 + $0x8] sm:$0xff] %vm770_vm0, %v769_v60 }
 0x1ea   :  { %777 = vsyncpa [#allocation4], 1 }
 0x1eb   :  { %778 = vsyncpa [#allocation6], 1 }

</bundles_post_ra>
